<compile_context>
chip_gen: v7x
topology: tpu7x:2x2x1
jax: 0.10.0
libtpu: 0.0.40
codegen_flags: <defaults>
</compile_context>

<pallas_src>
import jax
import jax.numpy as jnp
from jax import lax
from jax.experimental import pallas as pl
from jax.experimental.pallas import tpu as pltpu

_LANE = 128
_SUBLANE = 8
_MAX_TB = 2048


def _round_up(x, m):
    return (x + m - 1) // m * m


def actor_net_kernel(obs_ref, gum_ref,
                     w1_ref, b1_ref, w2_ref, b2_ref, w3_ref, b3_ref,
                     out_ref):
    cdt = w1_ref.dtype  # matmul-operand dtype (bf16 on MXU-native chips)
    x = obs_ref[...]

    # --- MLP hot path: MXU matmuls (f32 accumulate), VPU elementwise in f32 ---
    h1 = jnp.dot(x.astype(cdt), w1_ref[...],
                 preferred_element_type=jnp.float32) + b1_ref[...]
    h1 = jnp.maximum(h1, 0.0)
    h2 = jnp.dot(h1.astype(cdt), w2_ref[...],
                 preferred_element_type=jnp.float32) + b2_ref[...]
    h2 = jnp.maximum(h2, 0.0)
    # w3 is (hidden_pad, n_actions): logits come out at the true action width,
    # so no padded-lane masking is needed anywhere downstream.
    logits = jnp.dot(h2.astype(cdt), w3_ref[...],
                     preferred_element_type=jnp.float32) + b3_ref[...]

    # --- numerically stable log-softmax over the action axis (f32) ---
    m = jnp.max(logits, axis=-1, keepdims=True)
    shifted = logits - m
    lse = jnp.log(jnp.sum(jnp.exp(shifted), axis=-1, keepdims=True))
    log_probs = shifted - lse

    # --- categorical sample via Gumbel-max, then log_prob gather ---
    z = log_probs + gum_ref[...]
    col = lax.broadcasted_iota(jnp.int32, z.shape, 1)
    zmax = jnp.max(z, axis=-1, keepdims=True)
    # first index attaining the max (matches argmax tie-breaking)
    idx = jnp.min(jnp.where(z == zmax, col, jnp.int32(z.shape[-1])),
                  axis=-1, keepdims=True)
    lp = jnp.sum(jnp.where(col == idx, log_probs, 0.0), axis=-1, keepdims=True)

    # --- tiny packed output block: lane 0 = log_prob, lane 1 = action index ---
    ocol = lax.broadcasted_iota(jnp.int32, out_ref.shape, 1)
    out_ref[...] = jnp.where(ocol == 0, lp, idx.astype(jnp.float32))


def actor_net_forward(obs, gumbel, padded_params):
    """Fused ActorNet forward.

    obs:           (B, input_size) float32
    gumbel:        (B, n_actions) float32 Gumbel(0,1) noise (Gumbel-max trick)
    padded_params: output of prepare_actor_params (padded / cast ONCE at init)
    Returns (action_index int32 (B,), log_prob float32 (B,)).
    """
    B, input_size = obs.shape
    n_actions = gumbel.shape[1]
    assert n_actions < (1 << 24)  # action index round-trips exactly through f32

    w1, b1 = padded_params["w1"], padded_params["b1"]
    w2, b2 = padded_params["w2"], padded_params["b2"]
    w3, b3 = padded_params["w3"], padded_params["b3"]

    # Batch tile: large enough to amortize per-grid-step overhead and keep the
    # DMA pipeline busy (cap 2048 rows); when the batch is big enough, force at
    # least 2 tiles so the "parallel" axis can shard across both v7x TCs.
    b8 = _round_up(B, _SUBLANE)
    if b8 <= _SUBLANE:
        tb = b8
    else:
        tb = min(_MAX_TB, _round_up(pl.cdiv(b8, 2), _SUBLANE))
    b_p = _round_up(B, tb)

    obs_p = jnp.pad(obs, ((0, b_p - B), (0, 0)))
    gum_p = jnp.pad(gumbel, ((0, b_p - B), (0, 0)))

    grid = (b_p // tb,)

    def batch_spec(cols):
        # blocked along the batch axis -> pipelined, double-buffered DMA
        return pl.BlockSpec((tb, cols), lambda i: (i, 0))

    def resident_spec(shape):
        # constant index_map -> fetched once, stays VMEM-resident across tiles
        return pl.BlockSpec(shape, lambda i: (0, 0))

    out = pl.pallas_call(
        actor_net_kernel,
        grid=grid,
        in_specs=[
            batch_spec(input_size),               # obs (tb, input_size)
            batch_spec(n_actions),                # gumbel (tb, n_actions), unpadded
            resident_spec(w1.shape), resident_spec(b1.shape),
            resident_spec(w2.shape), resident_spec(b2.shape),
            resident_spec(w3.shape), resident_spec(b3.shape),
        ],
        out_specs=pl.BlockSpec((tb, 2), lambda i: (i, 0)),
        out_shape=jax.ShapeDtypeStruct((b_p, 2), jnp.float32),
        compiler_params=pltpu.CompilerParams(
            dimension_semantics=("parallel",),    # megacore sharding on v7x
        ),
    )(obs_p, gum_p, w1, b1, w2, b2, w3, b3)

    log_prob = out[:B, 0]
    action = out[:B, 1].astype(jnp.int32)  # small ints are exact in f32
    return action, log_prob


def init_actor_params(key, input_size, output_size, hidden_dim):
    """Deterministic init mimicking nn.Linear default (uniform +/- 1/sqrt(fan_in)).

    Weights are stored as (in, out) so the kernel does x @ W + b.
    """
    ks = jax.random.split(key, 6)

    def linear(kw, kb, fan_in, fan_out):
        bound = 1.0 / jnp.sqrt(jnp.float32(fan_in))
        w = jax.random.uniform(kw, (fan_in, fan_out), jnp.float32, -bound, bound)
        b = jax.random.uniform(kb, (1, fan_out), jnp.float32, -bound, bound)
        return w, b

    w1, b1 = linear(ks[0], ks[1], input_size, hidden_dim)
    w2, b2 = linear(ks[2], ks[3], hidden_dim, hidden_dim)
    w3, b3 = linear(ks[4], ks[5], hidden_dim, output_size)
    return {"w1": w1, "b1": b1, "w2": w2, "b2": b2, "w3": w3, "b3": b3}


def prepare_actor_params(params, matmul_dtype=jnp.bfloat16):
    """One-time weight prep: zero-pad hidden dims to 128 lanes, cast weights to
    the matmul dtype. Call once at init, NOT per forward call."""
    hidden = params["w1"].shape[1]
    h_p = _round_up(hidden, _LANE)
    dh = h_p - hidden
    return {
        "w1": jnp.pad(params["w1"], ((0, 0), (0, dh))).astype(matmul_dtype),
        "b1": jnp.pad(params["b1"], ((0, 0), (0, dh))).astype(jnp.float32),
        "w2": jnp.pad(params["w2"], ((0, dh), (0, dh))).astype(matmul_dtype),
        "b2": jnp.pad(params["b2"], ((0, 0), (0, dh))).astype(jnp.float32),
        "w3": jnp.pad(params["w3"], ((0, dh), (0, 0))).astype(matmul_dtype),
        "b3": params["b3"].astype(jnp.float32),
    }


def _reference_forward(obs, gumbel, params, matmul_dtype=jnp.bfloat16):
    """Pure-JAX reference with the same matmul-operand casts as the kernel."""
    def lin(x, w, b):
        return jnp.dot(x.astype(matmul_dtype), w.astype(matmul_dtype),
                       preferred_element_type=jnp.float32) + b
    h1 = jnp.maximum(lin(obs, params["w1"], params["b1"]), 0.0)
    h2 = jnp.maximum(lin(h1, params["w2"], params["b2"]), 0.0)
    log_p = jax.nn.log_softmax(lin(h2, params["w3"], params["b3"]), axis=-1)
    action = jnp.argmax(log_p + gumbel, axis=-1).astype(jnp.int32)
    log_prob = jnp.take_along_axis(log_p, action[:, None], axis=-1)[:, 0]
    return action, log_prob


if __name__ == "__main__":
    B, INPUT_SIZE, OUTPUT_SIZE, HIDDEN_DIM = 8, 16, 8, 32

    root = jax.random.PRNGKey(0)
    k_obs, k_params, k_gumbel = jax.random.split(root, 3)

    obs = jax.random.normal(k_obs, (B, INPUT_SIZE), jnp.float32)
    params = init_actor_params(k_params, INPUT_SIZE, OUTPUT_SIZE, HIDDEN_DIM)
    padded_params = prepare_actor_params(params)  # pad + bf16-cast ONCE
    # Gumbel(0,1) noise for exact categorical sampling (Gumbel-max trick).
    # TODO(synk): torch Categorical.sample() RNG replaced by host-supplied Gumbel noise.
    gumbel = jax.random.gumbel(k_gumbel, (B, OUTPUT_SIZE), jnp.float32)

    action, log_prob = actor_net_forward(obs, gumbel, padded_params)
    jax.block_until_ready((action, log_prob))

    # sanity check against a pure-JAX reference using identical matmul casts
    ref_action, ref_logprob = _reference_forward(obs, gumbel, params)
    assert action.shape == (B,) and log_prob.shape == (B,)
    assert jnp.all(action == ref_action)
    assert jnp.allclose(log_prob, ref_logprob, atol=1e-4, rtol=1e-4)

    print("KERNEL_OK")
</pallas_src>

<mosaic_0001>
module attributes {stable_mosaic.version = 11 : i64} {
  func.func @actor_net_kernel(%arg0: i32, %arg1: memref<8x16xf32, #tpu.memory_space<vmem>>, %arg2: memref<8x8xf32, #tpu.memory_space<vmem>>, %arg3: memref<16x128xbf16, #tpu.memory_space<vmem>>, %arg4: memref<1x128xf32, #tpu.memory_space<vmem>>, %arg5: memref<128x128xbf16, #tpu.memory_space<vmem>>, %arg6: memref<1x128xf32, #tpu.memory_space<vmem>>, %arg7: memref<128x8xbf16, #tpu.memory_space<vmem>>, %arg8: memref<1x8xf32, #tpu.memory_space<vmem>>, %arg9: memref<8x2xf32, #tpu.memory_space<vmem>>) attributes {dimension_semantics = [#tpu.dimension_semantics<parallel>], iteration_bounds = array<i64: 1>, scalar_prefetch = 0 : i64, scratch_operands = 0 : i64, tpu.core_type = #tpu.core_type<tc>, window_params = [{transform_indices = @transform_0, window_bounds = array<i64: 8, 16>}, {transform_indices = @transform_1, window_bounds = array<i64: 8, 8>}, {pipeline_mode = #tpu.pipeline_mode<synchronous>, transform_indices = @transform_2, window_bounds = array<i64: 16, 128>}, {pipeline_mode = #tpu.pipeline_mode<synchronous>, transform_indices = @transform_3, window_bounds = array<i64: 1, 128>}, {pipeline_mode = #tpu.pipeline_mode<synchronous>, transform_indices = @transform_4, window_bounds = array<i64: 128, 128>}, {pipeline_mode = #tpu.pipeline_mode<synchronous>, transform_indices = @transform_5, window_bounds = array<i64: 1, 128>}, {pipeline_mode = #tpu.pipeline_mode<synchronous>, transform_indices = @transform_6, window_bounds = array<i64: 128, 8>}, {pipeline_mode = #tpu.pipeline_mode<synchronous>, transform_indices = @transform_7, window_bounds = array<i64: 1, 8>}, {transform_indices = @transform_8, window_bounds = array<i64: 8, 2>}]} {
    %c0 = arith.constant 0 : index
    %c0_0 = arith.constant 0 : index
    %0 = vector.load %arg1[%c0, %c0_0] : memref<8x16xf32, #tpu.memory_space<vmem>>, vector<8x16xf32>
    %1 = arith.truncf %0 : vector<8x16xf32> to vector<8x16xbf16>
    %c0_1 = arith.constant 0 : index
    %c0_2 = arith.constant 0 : index
    %2 = vector.load %arg3[%c0_1, %c0_2] : memref<16x128xbf16, #tpu.memory_space<vmem>>, vector<16x128xbf16>
    %cst = arith.constant dense<0.000000e+00> : vector<8x128xf32>
    %3 = tpu.matmul %1, %2, %cst {dimension_numbers = #tpu.dot_dimension_numbers<[1], [0], [0], [1], [0, 0, 1, 1], [], []>} : vector<8x16xbf16>, vector<16x128xbf16>, vector<8x128xf32> -> vector<8x128xf32>
    %c0_3 = arith.constant 0 : index
    %c0_4 = arith.constant 0 : index
    %4 = vector.load %arg4[%c0_3, %c0_4] : memref<1x128xf32, #tpu.memory_space<vmem>>, vector<1x128xf32>
    %5 = vector.broadcast %4 : vector<1x128xf32> to vector<8x128xf32>
    %6 = arith.addf %3, %5 : vector<8x128xf32>
    %cst_5 = arith.constant 0.000000e+00 : f32
    %7 = vector.broadcast %cst_5 : f32 to vector<8x128xf32>
    %8 = arith.maximumf %6, %7 : vector<8x128xf32>
    %9 = arith.truncf %8 : vector<8x128xf32> to vector<8x128xbf16>
    %c0_6 = arith.constant 0 : index
    %c0_7 = arith.constant 0 : index
    %10 = vector.load %arg5[%c0_6, %c0_7] : memref<128x128xbf16, #tpu.memory_space<vmem>>, vector<128x128xbf16>
    %cst_8 = arith.constant dense<0.000000e+00> : vector<8x128xf32>
    %11 = tpu.matmul %9, %10, %cst_8 {dimension_numbers = #tpu.dot_dimension_numbers<[1], [0], [0], [1], [0, 0, 1, 1], [], []>} : vector<8x128xbf16>, vector<128x128xbf16>, vector<8x128xf32> -> vector<8x128xf32>
    %c0_9 = arith.constant 0 : index
    %c0_10 = arith.constant 0 : index
    %12 = vector.load %arg6[%c0_9, %c0_10] : memref<1x128xf32, #tpu.memory_space<vmem>>, vector<1x128xf32>
    %13 = vector.broadcast %12 : vector<1x128xf32> to vector<8x128xf32>
    %14 = arith.addf %11, %13 : vector<8x128xf32>
    %cst_11 = arith.constant 0.000000e+00 : f32
    %15 = vector.broadcast %cst_11 : f32 to vector<8x128xf32>
    %16 = arith.maximumf %14, %15 : vector<8x128xf32>
    %17 = arith.truncf %16 : vector<8x128xf32> to vector<8x128xbf16>
    %c0_12 = arith.constant 0 : index
    %c0_13 = arith.constant 0 : index
    %18 = vector.load %arg7[%c0_12, %c0_13] : memref<128x8xbf16, #tpu.memory_space<vmem>>, vector<128x8xbf16>
    %cst_14 = arith.constant dense<0.000000e+00> : vector<8x8xf32>
    %19 = tpu.matmul %17, %18, %cst_14 {dimension_numbers = #tpu.dot_dimension_numbers<[1], [0], [0], [1], [0, 0, 1, 1], [], []>} : vector<8x128xbf16>, vector<128x8xbf16>, vector<8x8xf32> -> vector<8x8xf32>
    %c0_15 = arith.constant 0 : index
    %c0_16 = arith.constant 0 : index
    %20 = vector.load %arg8[%c0_15, %c0_16] : memref<1x8xf32, #tpu.memory_space<vmem>>, vector<1x8xf32>
    %21 = vector.broadcast %20 : vector<1x8xf32> to vector<8x8xf32>
    %22 = arith.addf %19, %21 : vector<8x8xf32>
    %cst_17 = arith.constant dense<0xFF800000> : vector<8xf32>
    %23 = vector.multi_reduction <maximumf>, %22, %cst_17 [1] : vector<8x8xf32> to vector<8xf32>
    %24 = vector.shape_cast %23 : vector<8xf32> to vector<8x1xf32>
    %25 = vector.broadcast %24 : vector<8x1xf32> to vector<8x8xf32>
    %26 = arith.subf %22, %25 : vector<8x8xf32>
    %27 = math.exp %26 : vector<8x8xf32>
    %cst_18 = arith.constant dense<0.000000e+00> : vector<8xf32>
    %28 = vector.multi_reduction <add>, %27, %cst_18 [1] : vector<8x8xf32> to vector<8xf32>
    %29 = vector.shape_cast %28 : vector<8xf32> to vector<8x1xf32>
    %30 = math.log %29 : vector<8x1xf32>
    %31 = vector.broadcast %30 : vector<8x1xf32> to vector<8x8xf32>
    %32 = arith.subf %26, %31 : vector<8x8xf32>
    %c0_19 = arith.constant 0 : index
    %c0_20 = arith.constant 0 : index
    %33 = vector.load %arg2[%c0_19, %c0_20] : memref<8x8xf32, #tpu.memory_space<vmem>>, vector<8x8xf32>
    %34 = arith.addf %32, %33 : vector<8x8xf32>
    %35 = tpu.iota {dimensions = array<i32: 1>} : vector<8x8xi32>
    %cst_21 = arith.constant dense<0xFF800000> : vector<8xf32>
    %36 = vector.multi_reduction <maximumf>, %34, %cst_21 [1] : vector<8x8xf32> to vector<8xf32>
    %37 = vector.shape_cast %36 : vector<8xf32> to vector<8x1xf32>
    %38 = vector.broadcast %37 : vector<8x1xf32> to vector<8x8xf32>
    %39 = arith.cmpf oeq, %34, %38 : vector<8x8xf32>
    %c8_i32 = arith.constant 8 : i32
    %40 = vector.broadcast %c8_i32 : i32 to vector<8x8xi32>
    %41 = arith.select %39, %35, %40 : vector<8x8xi1>, vector<8x8xi32>
    %cst_22 = arith.constant dense<2147483647> : vector<8xi32>
    %42 = vector.multi_reduction <minsi>, %41, %cst_22 [1] : vector<8x8xi32> to vector<8xi32>
    %43 = vector.shape_cast %42 : vector<8xi32> to vector<8x1xi32>
    %44 = vector.broadcast %43 : vector<8x1xi32> to vector<8x8xi32>
    %45 = arith.cmpi eq, %35, %44 : vector<8x8xi32>
    %cst_23 = arith.constant 0.000000e+00 : f32
    %46 = vector.broadcast %cst_23 : f32 to vector<8x8xf32>
    %47 = arith.select %45, %32, %46 : vector<8x8xi1>, vector<8x8xf32>
    %cst_24 = arith.constant dense<0.000000e+00> : vector<8xf32>
    %48 = vector.multi_reduction <add>, %47, %cst_24 [1] : vector<8x8xf32> to vector<8xf32>
    %49 = vector.shape_cast %48 : vector<8xf32> to vector<8x1xf32>
    %50 = tpu.iota {dimensions = array<i32: 1>} : vector<8x2xi32>
    %c0_i32 = arith.constant 0 : i32
    %51 = vector.broadcast %c0_i32 : i32 to vector<8x2xi32>
    %52 = arith.cmpi eq, %50, %51 : vector<8x2xi32>
    %53 = arith.sitofp %43 : vector<8x1xi32> to vector<8x1xf32>
    %54 = vector.shape_cast %49 : vector<8x1xf32> to vector<8x1xf32>
    %55 = vector.broadcast %54 : vector<8x1xf32> to vector<8x2xf32>
    %56 = vector.shape_cast %53 : vector<8x1xf32> to vector<8x1xf32>
    %57 = vector.broadcast %56 : vector<8x1xf32> to vector<8x2xf32>
    %58 = arith.select %52, %55, %57 : vector<8x2xi1>, vector<8x2xf32>
    %c0_25 = arith.constant 0 : index
    %c0_26 = arith.constant 0 : index
    %59 = vector.load %arg9[%c0_25, %c0_26] : memref<8x2xf32, #tpu.memory_space<vmem>>, vector<8x2xf32>
    tpu.vector_store %arg9[%c0_25, %c0_26], %58 {strides = array<i32>} : memref<8x2xf32, #tpu.memory_space<vmem>>, vector<8x2xf32>,
    return
  }
  func.func @transform_0(%arg0: i32) -> (i32, i32) {
    %c0_i32 = arith.constant 0 : i32
    %c0_i32_0 = arith.constant 0 : i32
    return %arg0, %c0_i32 : i32, i32
  }
  func.func @transform_1(%arg0: i32) -> (i32, i32) {
    %c0_i32 = arith.constant 0 : i32
    %c0_i32_0 = arith.constant 0 : i32
    return %arg0, %c0_i32 : i32, i32
  }
  func.func @transform_2(%arg0: i32) -> (i32, i32) {
    %c0_i32 = arith.constant 0 : i32
    %c0_i32_0 = arith.constant 0 : i32
    %c0_i32_1 = arith.constant 0 : i32
    return %c0_i32, %c0_i32_0 : i32, i32
  }
  func.func @transform_3(%arg0: i32) -> (i32, i32) {
    %c0_i32 = arith.constant 0 : i32
    %c0_i32_0 = arith.constant 0 : i32
    %c0_i32_1 = arith.constant 0 : i32
    return %c0_i32, %c0_i32_0 : i32, i32
  }
  func.func @transform_4(%arg0: i32) -> (i32, i32) {
    %c0_i32 = arith.constant 0 : i32
    %c0_i32_0 = arith.constant 0 : i32
    %c0_i32_1 = arith.constant 0 : i32
    return %c0_i32, %c0_i32_0 : i32, i32
  }
  func.func @transform_5(%arg0: i32) -> (i32, i32) {
    %c0_i32 = arith.constant 0 : i32
    %c0_i32_0 = arith.constant 0 : i32
    %c0_i32_1 = arith.constant 0 : i32
    return %c0_i32, %c0_i32_0 : i32, i32
  }
  func.func @transform_6(%arg0: i32) -> (i32, i32) {
    %c0_i32 = arith.constant 0 : i32
    %c0_i32_0 = arith.constant 0 : i32
    %c0_i32_1 = arith.constant 0 : i32
    return %c0_i32, %c0_i32_0 : i32, i32
  }
  func.func @transform_7(%arg0: i32) -> (i32, i32) {
    %c0_i32 = arith.constant 0 : i32
    %c0_i32_0 = arith.constant 0 : i32
    %c0_i32_1 = arith.constant 0 : i32
    return %c0_i32, %c0_i32_0 : i32, i32
  }
  func.func @transform_8(%arg0: i32) -> (i32, i32) {
    %c0_i32 = arith.constant 0 : i32
    %c0_i32_0 = arith.constant 0 : i32
    return %arg0, %c0_i32 : i32, i32
  }
}

</mosaic_0001>

<bundles_post_ra>
// kernel: tpu_custom_call.1
= control target key start
LH: loop header
LB: loop body
LE: loop exit
PB: predicated region body
PF: predicated region fallthrough
CT: control target
= control target key end

     0   :  { %13 = vsyncpa [#allocation3], 0  ;;  %s520_s27 = smov [#allocation2]   ;;  %s673_s0 = inlined_call_operand.vmem [shape: f32[8,16], index: 0, kind: input, shape index: {}]   ;;  %s674_s1 = inlined_call_operand.vmem [shape: f32[8,8], index: 1, kind: input, shape index: {}]   ;;  %s675_s2 = inlined_call_operand.hbm [shape: bf16[16,128], index: 2, kind: input, shape index: {}]   ;;  %s676_s3 = inlined_call_operand.vmem [shape: f32[1,128], index: 3, kind: input, shape index: {}]   ;;  %s677_s4 = inlined_call_operand.vmem [shape: bf16[128,128], index: 4, kind: input, shape index: {}]   ;;  %s678_s5 = inlined_call_operand.vmem [shape: f32[1,128], index: 5, kind: input, shape index: {}]   ;;  %s679_s6 = inlined_call_operand.vmem [shape: bf16[128,8], index: 6, kind: input, shape index: {}]   ;;  %s680_s7 = inlined_call_operand.vmem [shape: f32[1,8], index: 7, kind: input, shape index: {}]   ;;  %s681_s8 = inlined_call_operand.vmem [shape: f32[8,2], index: 8, kind: output, shape index: {}]  }
   0x1   :  { %s23_s28 = sshll.u32 %s520_s27, 4  ;;  %s496_s9 = scalar_lea.hbm %s675_s2, 128  ;;  %s24_s28 = int_to_ptr.vmem [resolvable:$true] %s23_s28 }
   0x2   :  { %p497_p0 = scmp.ne.s32.totalorder %s675_s2, %s496_s9  ;;  %p500_p1 = scmp.lt.u32.totalorder %s496_s9, %s675_s2 }
   0x4   :  { %p502_p2 = pnand %p500_p1, %p497_p0 }
   0x6   :  { %505 = shalt.err (!%p502_p2)
}
   0x7   :  { %s506_s14 = scalar_lea.vmem %s24_s28, 128  ;;  %p511_p4 = scmp.lt.s32.totalorder %s24_s28, %s24_s28 }
   0x8   :  { %p507_p3 = scmp.ne.s32.totalorder %s24_s28, %s506_s14  ;;  %p512_p5 = scmp.lt.s32.totalorder %s506_s14, %s506_s14 }
   0xa   :  { %p513_p6 = por %p512_p5, %p511_p4 }
   0xc   :  { %p514_p7 = pnand %p513_p6, %p507_p3 }
   0xe   :  { %517 = shalt.err (!%p514_p7)
}
   0xf   :  { %s521_s15 = smov 64   ;;  %s522_s16 = smov 4  }
  0x10   :  { %29 = dma.hbm_to_vmem [thread:$0]  %s675_s2, 128, %s24_s28, [#allocation3], %s521_s15, %s521_s15, %s522_s16  }
  0x11   :  { %518 = dma.done.wait [#allocation3], 128  }
  0x12   :  { %519 = vsyncadd [#allocation3], 4294967168  ;;  %v523_v0 = vmov 0.0   ;;  %vm524_vm0 = vmmov 0   ;;  %v475_v1 = vld [vmem:[#allocation2] sm:$0xff]   ;;  %vm61_vm1 = vcmask 130048   ;;  %v346_v55 = vlaneseq }
  0x13   :  { %424 = vmatprep.subr.bf16.mxu0 %v523_v0  ;;  %426 = vmatprep.mubr.msk.bf16.mxu0 %vm524_vm0, %v523_v0  ;;  %v44_v2 = vld [vmem:[%s673_s0] sm:$0xff]  ;;  %v477_v5 = vld [vmem:[%s677_s4 + $0x8] sm:$0xff]   ;;  %v478_v6 = vld [vmem:[%s677_s4 + $0x10] sm:$0xff]   ;;  %vm331_vm2 = vcmask 64512   ;;  %vm376_vm7 = vcmask 15360  }
  0x14   :  { %430 = vmatprep.subr.bf16.mxu1 %v523_v0  ;;  %446 = vmatprep.mubr.msk.bf16.mxu1 %vm524_vm0, %v523_v0  ;;  %v45_v3 = vpack.c.bf16 %v44_v2, %v44_v2  ;;  %v476_v4 = vld [vmem:[%s677_s4] sm:$0xff]   ;;  %v479_v7 = vld [vmem:[%s677_s4 + $0x18] sm:$0xff]   ;;  %v481_v9 = vld [vmem:[%s677_s4 + $0x28] sm:$0xff]   ;;  %v347_v56 = vand.u32 127, %v346_v55 }
  0x15   :  { %425 = vmatpush3.bf16.msra.mxu0 %v475_v1  ;;  %431 = vmatpush3.bf16.msra.mxu1 %v476_v4  ;;  %v480_v8 = vld [vmem:[%s677_s4 + $0x20] sm:$0xff]   ;;  %v482_v10 = vld [vmem:[%s677_s4 + $0x30] sm:$0xff]   ;;  %v483_v11 = vld [vmem:[%s677_s4 + $0x38] sm:$0xff]  }
  0x16   :  { %450 = vmatprep.subr.bf16.mxu0 %v523_v0  ;;  %432 = vmatprep.subr.bf16.mxu1 %v523_v0  ;;  %v484_v12 = vld [vmem:[%s679_s6] sm:$0xff]   ;;  %v485_v13 = vld [vmem:[%s679_s6 + $0x8] sm:$0xff]   ;;  %v486_v14 = vld [vmem:[%s679_s6 + $0x10] sm:$0xff]   ;;  %vm373_vm6 = vcmp.eq.s32.totalorder %v347_v56, 0 }
  0x17   :  { %v487_v15 = vld [vmem:[%s679_s6 + $0x18] sm:$0xff]   ;;  %v488_v16 = vld [vmem:[%s679_s6 + $0x20] sm:$0xff]   ;;  %v489_v17 = vld [vmem:[%s679_s6 + $0x28] sm:$0xff]  }
  0x18   :  { %427 = vmatmul.mubr.msk.bf16.vlgmr.msra.gmra.mrb[0].mxu0 %vm61_vm1, %v45_v3  ;;  %v383_v18 = vld [vmem:[%s676_s3] ss:$0 sm:$0xff]  ;;  %v490_v26 = vld [vmem:[%s679_s6 + $0x30] sm:$0xff]   ;;  %v491_v27 = vld [vmem:[%s679_s6 + $0x38] sm:$0xff]  }
  0x19   :  { %466 = vmatprep.mubr.msk.bf16.mxu0 %vm524_vm0, %v523_v0  ;;  %433 = vmatpush3.bf16.msra.mxu1 %v477_v5  ;;  %v386_v28 = vld [vmem:[%s678_s5] ss:$0 sm:$0xff] }
  0x1a   :  { %434 = vmatprep.subr.bf16.mxu1 %v523_v0  ;;  %451 = vmatpush3.bf16.msra.mxu0 %v484_v12  ;;  %v395_v36 = vld [vmem:[%s680_s7] ss:$0 sm:$0xff] }
  0x1b   :  { %452 = vmatprep.subr.bf16.mxu0 %v523_v0  ;;  %v344_v51 = vld [vmem:[%s674_s1] sm:$0xff] }
  0x1d   :  { %435 = vmatpush3.bf16.msra.mxu1 %v478_v6 }
  0x1e   :  { %436 = vmatprep.subr.bf16.mxu1 %v523_v0  ;;  %453 = vmatpush3.bf16.msra.mxu0 %v485_v13 }
  0x1f   :  { %454 = vmatprep.subr.bf16.mxu0 %v523_v0 }
  0x21   :  { %437 = vmatpush3.bf16.msra.mxu1 %v479_v7 }
  0x22   :  { %438 = vmatprep.subr.bf16.mxu1 %v523_v0  ;;  %455 = vmatpush3.bf16.msra.mxu0 %v486_v14 }
  0x23   :  { %456 = vmatprep.subr.bf16.mxu0 %v523_v0 }
  0x25   :  { %439 = vmatpush3.bf16.msra.mxu1 %v480_v8 }
  0x26   :  { %440 = vmatprep.subr.bf16.mxu1 %v523_v0  ;;  %457 = vmatpush3.bf16.msra.mxu0 %v487_v15 }
  0x27   :  { %458 = vmatprep.subr.bf16.mxu0 %v523_v0 }
  0x29   :  { %441 = vmatpush3.bf16.msra.mxu1 %v481_v9 }
  0x2a   :  { %442 = vmatprep.subr.bf16.mxu1 %v523_v0  ;;  %459 = vmatpush3.bf16.msra.mxu0 %v488_v16 }
  0x2b   :  { %460 = vmatprep.subr.bf16.mxu0 %v523_v0 }
  0x2d   :  { %443 = vmatpush3.bf16.msra.mxu1 %v482_v10 }
  0x2e   :  { %444 = vmatprep.subr.bf16.mxu1 %v523_v0  ;;  %461 = vmatpush3.bf16.msra.mxu0 %v489_v17 }
  0x2f   :  { %462 = vmatprep.subr.bf16.mxu0 %v523_v0 }
  0x31   :  { %445 = vmatpush3.bf16.msra.mxu1 %v483_v11 }
  0x32   :  { %463 = vmatpush3.bf16.msra.mxu0 %v490_v26 }
  0x33   :  { %464 = vmatprep.subr.bf16.mxu0 %v523_v0 }
  0x36   :  { %465 = vmatpush3.bf16.msra.mxu0 %v491_v27 }
  0xeb   :  { %v99_v19 = vpop.f32.mrb[0].mxu0 }
  0xec   :  { %v100_v20 = vadd.f32 %v383_v18, %v99_v19  ;;  %v428_v21 = vpop.f32.mrb[1].mxu0 }
  0xed   :  { %v102_v22 = vpop.f32.mrb[2].mxu0 }
  0xee   :  { %v105_v23 = vmax.f32 %v100_v20, 0.0  ;;  %v429_v24 = vpop.f32.mrb[3].mxu0 }
  0xf0   :  { %v106_v25 = vpack.c.bf16 %v105_v23, %v105_v23 }
  0xf2   :  { %447 = vmatmul.mubr.bf16.vlgmr.msra.gmra.mrb[0].mxu1 %v106_v25 }
 0x1c5   :  { %v212_v29 = vpop.f32.mrb[0].mxu1 }
 0x1c6   :  { %v213_v30 = vadd.f32 %v386_v28, %v212_v29  ;;  %v448_v31 = vpop.f32.mrb[1].mxu1 }
 0x1c7   :  { %v215_v32 = vpop.f32.mrb[2].mxu1 }
 0x1c8   :  { %v218_v33 = vmax.f32 %v213_v30, 0.0  ;;  %v449_v34 = vpop.f32.mrb[3].mxu1 }
 0x1ca   :  { %v219_v35 = vpack.c.bf16 %v218_v33, %v218_v33 }
 0x1cc   :  { %467 = vmatmul.mubr.bf16.vlgmr.msra.gmra.mrb[4].mxu0 %v219_v35 }
 0x29f   :  { %v325_v37 = vpop.f32.mrb[4].mxu0 }
 0x2a0   :  { %v326_v38 = vadd.f32 %v395_v36, %v325_v37  ;;  %v468_v39 = vpop.f32.mrb[5].mxu0 }
 0x2a1   :  { %v328_v40 = vpop.f32.mrb[6].mxu0 }
 0x2a2   :  { %v469_v41 = vpop.f32.mrb[7].mxu0  ;;  %v332_v42 = vsel %vm331_vm2, %v326_v38, -inf }
 0x2a3   :  { %333 = vmax.xlane.f32.xlu0 %v332_v42 }
 0x330   :  { %v334_v43 = vpop.xlane.xlu0 %333 }
 0x331   :  { %v335_v44 = vsub.f32 %v326_v38, %v334_v43 }
 0x333   :  { %v336_v45 = vmul.f32 1.442695, %v335_v44 }
 0x335   :  { %492 = vpow2.f32 %v336_v45 }
 0x33f   :  { %v493_v46 = vpop.eup %492 }
 0x340   :  { %v338_v47 = vsel %vm331_vm2, %v493_v46, 0.0 }
 0x341   :  { %339 = vadd.xlane.f32.xlu0 %v338_v47 }
 0x3ce   :  { %v340_v48 = vpop.xlane.xlu0 %339 }
 0x3cf   :  { %494 = vlog2.f32 %v340_v48 }
 0x3d9   :  { %v495_v49 = vpop.eup %494 }
 0x3da   :  { %v342_v50 = vmul.f32 0.6931472, %v495_v49 }
 0x3dc   :  { %v343_v52 = vsub.f32 %v335_v44, %v342_v50 }
 0x3de   :  { %v345_v53 = vadd.f32 %v344_v51, %v343_v52 }
 0x3e0   :  { %v348_v54 = vsel %vm331_vm2, %v345_v53, -inf }
 0x3e1   :  { %349 = vmax.xlane.f32.xlu1 %v348_v54 }
 0x46e   :  { %v350_v57 = vpop.xlane.xlu1 %349 }
 0x46f   :  { %vm351_vm3 = vcmp.eq.f32.partialorder %v345_v53, %v350_v57 }
 0x470   :  { %v352_v58 = vsel %vm351_vm3, %v347_v56, 8 }
 0x471   :  { %v353_v59 = vsel %vm331_vm2, %v352_v58, 2147483647 }
 0x472   :  { %v355_v60 = vshra.s32 %v353_v59, 16  ;;  %v354_v62 = vand.u32 65535, %v353_v59 }
 0x474   :  { %v357_v61 = vcvt.s32.f32 %v355_v60  ;;  %v356_v0 = vcvt.s32.f32 %v354_v62 }
 0x476   :  { %358 = vmin.xlane.f32.xlu1 %v357_v61 }
 0x503   :  { %v359_v63 = vpop.xlane.xlu1 %358 }
 0x504   :  { %vm360_vm4 = vcmp.eq.f32.partialorder %v357_v61, %v359_v63  ;;  %v365_v2 = vcvt.f32.s32 %v359_v63 }
 0x505   :  { %v361_v1 = vsel %vm360_vm4, %v356_v0, inf }
 0x506   :  { %362 = vmin.xlane.f32.xlu0 %v361_v1  ;;  %v366_v4 = vshll.u32 %v365_v2, 16 }
 0x593   :  { %v363_v3 = vpop.xlane.xlu0 %362 }
 0x594   :  { %v364_v5 = vcvt.f32.s32 %v363_v3 }
 0x596   :  { %v367_v6 = vadd.s32 %v366_v4, %v364_v5 }
 0x598   :  { %vm368_vm5 = vcmp.eq.s32.totalorder %v347_v56, %v367_v6  ;;  %v374_v9 = vcvt.s32.f32 %v367_v6 }
 0x599   :  { %v369_v7 = vsel %vm368_vm5, %v343_v52, 0.0 }
 0x59a   :  { %v370_v8 = vsel %vm331_vm2, %v369_v7, 0.0 }
 0x59b   :  { %371 = vadd.xlane.f32.xlu1 %v370_v8 }
 0x628   :  { %v372_v10 = vpop.xlane.xlu1 %371 }
 0x629   :  { %v375_v11 = vsel %vm373_vm6, %v372_v10, %v374_v9 }
 0x62a   :  { %377 = vst.msk [vmem:[%s681_s8] sm:$0xff] %vm376_vm7, %v375_v11 }
 0x62b   :  { %382 = vsyncpa [#allocation3], 1 }

</bundles_post_ra>
